<compile_context>
chip_gen: v6e
topology: v6e:2x2x1
jax: 0.10.0
libtpu: 0.0.40
codegen_flags: <defaults>
</compile_context>

<pallas_src>
import functools

import jax
import jax.numpy as jnp
from jax.experimental import pallas as pl
from jax.experimental.pallas import tpu as pltpu


def _round_up(a, m):
    return ((a + m - 1) // m) * m


def cbam_kernel(x_ref, w1_ref, b1_ref, w2_ref, b2_ref, out_ref, att_ref,
                *, s_true, s_chunk):
    """One grid step: TB samples, all channels, full (padded) spatial extent.

    x_ref  : (TB, C, Sp)   C on sublanes, Sp (multiple of 128) on lanes
    w1_ref : (C, Chp)      first Linear, stored (in, out); hidden padded to Chp
    b1_ref : (1, Chp)
    w2_ref : (Chp, C)      second Linear, stored (in, out)
    b2_ref : (1, C)
    out_ref: (TB, C, Sp)
    att_ref: (TB, 1, C)    channel_att_sum, lane-major
    """
    TB, C, Sp = x_ref.shape
    n_chunks = Sp // s_chunk

    # ---- fused sum + max pooling over S, one lane-dense chunk at a time --------
    sum_acc = jnp.zeros((TB, C), jnp.float32)
    max_acc = jnp.full((TB, C), -jnp.inf, jnp.float32)
    for c in range(n_chunks):
        start = c * s_chunk
        xc = x_ref[:, :, pl.ds(start, s_chunk)].astype(jnp.float32)   # (TB, C, s_chunk)
        sum_acc = sum_acc + jnp.sum(xc, axis=2)
        if start + s_chunk > s_true:
            # Only the last chunk can contain spatial padding; drop it from the max.
            lane = jax.lax.broadcasted_iota(jnp.int32, xc.shape, 2) + start
            xc = jnp.where(lane < s_true, xc, -jnp.inf)
        max_acc = jnp.maximum(max_acc, jnp.max(xc, axis=2))
    avg_pool = sum_acc * (1.0 / s_true)                                # (TB, C)

    # ---- shared-weight gate MLP on the MXU, both pooling paths in one batch ----
    p = jnp.concatenate([avg_pool, max_acc], axis=0)                   # (2*TB, C)
    h = jnp.dot(p, w1_ref[...], preferred_element_type=jnp.float32,
                precision=jax.lax.Precision.HIGHEST) + b1_ref[...]
    h = jnp.maximum(h, 0.0)                                            # (2*TB, Chp)
    att2 = jnp.dot(h, w2_ref[...], preferred_element_type=jnp.float32,
                   precision=jax.lax.Precision.HIGHEST) + b2_ref[...]  # (2*TB, C)
    att = att2[:TB] + att2[TB:]                                        # (TB, C)
    att_ref[:, 0, :] = att

    # ---- channel scaling: second chunked sweep over the same VMEM block --------
    scale3 = jax.nn.sigmoid(att)[:, :, None]                           # (TB, C, 1), hoisted
    for c in range(n_chunks):
        sl = pl.ds(c * s_chunk, s_chunk)
        out_ref[:, :, sl] = (
            x_ref[:, :, sl].astype(jnp.float32) * scale3
        ).astype(out_ref.dtype)


def _pick_batch_block(B, per_sample_bytes, target_bytes=2 << 20):
    """Largest divisor of B whose x-block stays near the byte target, keeping the
    "parallel" batch axis at >= 2 grid steps when possible (v7x dual-TC)."""
    cap = max(1, target_bytes // max(per_sample_bytes, 1))
    if B >= 2:
        cap = min(cap, B // 2)
    cap = max(1, min(cap, B))
    tb = 1
    for d in range(1, int(cap) + 1):
        if B % d == 0:
            tb = d
    return tb


def _pick_s_chunk(sp):
    """Lane-dense chunk length that divides the padded spatial extent."""
    if sp <= 4096:
        return sp
    for cand in (4096, 2048, 1024, 512, 256, 128):
        if sp % cand == 0:
            return cand
    return sp


def constrained_cbam(x, w1, b1, w2, b2):
    """x: (B, C, H, W). w1: (C, Ch), b1: (Ch,), w2: (Ch, C), b2: (C,).

    Returns (out (B, C, H, W) in x.dtype, l1 scalar f32)."""
    B, C, H, W = x.shape
    S = H * W
    Ch = w1.shape[1]
    assert w1.shape == (C, Ch) and w2.shape == (Ch, C)
    assert b1.shape == (Ch,) and b2.shape == (C,)

    # Lane-dense spatial extent: pad S to a multiple of 128 with zeros (max pool is
    # masked in-kernel; mean divides by the true S).
    Sp = _round_up(S, 128)
    x3 = x.reshape(B, C, S)
    xp = jnp.pad(x3, ((0, 0), (0, 0), (0, Sp - S))) if Sp != S else x3

    # Pad hidden width to a lane-dense multiple of 128 with zeros (exact no-op units).
    Chp = _round_up(Ch, 128)
    w1p = jnp.pad(w1.astype(jnp.float32), ((0, 0), (0, Chp - Ch)))
    b1p = jnp.pad(b1.astype(jnp.float32).reshape(1, Ch), ((0, 0), (0, Chp - Ch)))
    w2p = jnp.pad(w2.astype(jnp.float32), ((0, Chp - Ch), (0, 0)))
    b2p = b2.astype(jnp.float32).reshape(1, C)

    itemsize = jnp.dtype(x.dtype).itemsize
    TB = _pick_batch_block(B, C * Sp * itemsize)
    s_chunk = _pick_s_chunk(Sp)

    # VMEM budget from actual block bytes: double-buffered in/out/att blocks +
    # resident weights + per-chunk f32 temps + headroom (fits v7x's 64 MiB VMEM).
    x_block = TB * C * Sp * itemsize
    out_block = TB * C * Sp * itemsize
    att_block = TB * C * 4
    weights = (C * Chp + Chp + Chp * C + C) * 4
    temps = 3 * TB * C * s_chunk * 4
    need = 2 * (x_block + out_block + att_block) + weights + temps + (8 << 20)
    vmem_limit = int(min(max(need, 16 << 20), 100 << 20))

    kern = functools.partial(cbam_kernel, s_true=S, s_chunk=s_chunk)

    out_p, att3 = pl.pallas_call(
        kern,
        out_shape=(
            jax.ShapeDtypeStruct((B, C, Sp), x.dtype),
            jax.ShapeDtypeStruct((B, 1, C), jnp.float32),
        ),
        grid=(B // TB,),
        in_specs=[
            pl.BlockSpec((TB, C, Sp), lambda b: (b, 0, 0)),
            pl.BlockSpec((C, Chp), lambda b: (0, 0)),
            pl.BlockSpec((1, Chp), lambda b: (0, 0)),
            pl.BlockSpec((Chp, C), lambda b: (0, 0)),
            pl.BlockSpec((1, C), lambda b: (0, 0)),
        ],
        out_specs=(
            pl.BlockSpec((TB, C, Sp), lambda b: (b, 0, 0)),
            pl.BlockSpec((TB, 1, C), lambda b: (b, 0, 0)),
        ),
        compiler_params=pltpu.CompilerParams(
            dimension_semantics=("parallel",),
            vmem_limit_bytes=vmem_limit,
        ),
    )(xp, w1p, b1p, w2p, b2p)

    out3 = out_p[:, :, :S] if Sp != S else out_p
    out = out3.reshape(B, C, H, W)
    # Final scalar L1 is a tiny (B*C)-element abs-mean, reduced in the wrapper: the
    # batch grid axis is "parallel", so no cross-block accumulator in the kernel.
    l1 = jnp.mean(jnp.abs(att3))
    return out, l1


def reference(x, w1, b1, w2, b2):
    B, C, H, W = x.shape
    xf = x.reshape(B, C, -1)
    avg = xf.mean(axis=-1)
    mx = xf.max(axis=-1)

    def mlp(p):
        h = jnp.maximum(
            jnp.dot(p, w1, precision=jax.lax.Precision.HIGHEST) + b1, 0.0)
        return jnp.dot(h, w2, precision=jax.lax.Precision.HIGHEST) + b2

    att = mlp(avg) + mlp(mx)
    l1 = jnp.abs(att).mean()
    scale = jax.nn.sigmoid(att)[:, :, None, None]
    return x * scale, l1


if __name__ == "__main__":
    # Small shapes consistent with the module: gate_channels=32, reduction_ratio=16,
    # spatial 16x16 so S = 256 (already a multiple of 128 -> lane-dense IO).
    B, C, H, W = 2, 32, 16, 16
    reduction_ratio = 16
    Ch = max(1, C // reduction_ratio)  # hidden width of the gate MLP = 2

    key = jax.random.PRNGKey(0)
    kx, k1, k2, k3, k4 = jax.random.split(key, 5)

    x = jax.random.normal(kx, (B, C, H, W), dtype=jnp.float32)
    # Synthetic Linear parameters, stored as (in, out) like `p @ w + b`.
    w1 = jax.random.normal(k1, (C, Ch), dtype=jnp.float32) * 0.2
    b1 = jax.random.normal(k2, (Ch,), dtype=jnp.float32) * 0.1
    w2 = jax.random.normal(k3, (Ch, C), dtype=jnp.float32) * 0.2
    b2 = jax.random.normal(k4, (C,), dtype=jnp.float32) * 0.1

    out, l1 = constrained_cbam(x, w1, b1, w2, b2)
    jax.block_until_ready((out, l1))

    ref_out, ref_l1 = reference(x, w1, b1, w2, b2)
    # Tolerances leave headroom for MXU f32-pass / EUP sigmoid rounding differences
    # while still catching any real semantic bug (values are O(0.1 - 3)).
    assert jnp.allclose(out, ref_out, rtol=1e-3, atol=1e-4), "output mismatch"
    assert jnp.allclose(l1, ref_l1, rtol=1e-3, atol=1e-4), "l1 mismatch"

    print("KERNEL_OK")
</pallas_src>

<mosaic_0001>
module attributes {stable_mosaic.version = 11 : i64} {
  func.func @cbam_kernel(%arg0: i32, %arg1: memref<1x32x256xf32, #tpu.memory_space<vmem>>, %arg2: memref<32x128xf32, #tpu.memory_space<vmem>>, %arg3: memref<1x128xf32, #tpu.memory_space<vmem>>, %arg4: memref<128x32xf32, #tpu.memory_space<vmem>>, %arg5: memref<1x32xf32, #tpu.memory_space<vmem>>, %arg6: memref<1x32x256xf32, #tpu.memory_space<vmem>>, %arg7: memref<1x1x32xf32, #tpu.memory_space<vmem>>) attributes {dimension_semantics = [#tpu.dimension_semantics<parallel>], iteration_bounds = array<i64: 2>, scalar_prefetch = 0 : i64, scratch_operands = 0 : i64, tpu.core_type = #tpu.core_type<tc>, window_params = [{transform_indices = @transform_0, window_bounds = array<i64: 1, 32, 256>}, {pipeline_mode = #tpu.pipeline_mode<synchronous>, transform_indices = @transform_1, window_bounds = array<i64: 32, 128>}, {pipeline_mode = #tpu.pipeline_mode<synchronous>, transform_indices = @transform_2, window_bounds = array<i64: 1, 128>}, {pipeline_mode = #tpu.pipeline_mode<synchronous>, transform_indices = @transform_3, window_bounds = array<i64: 128, 32>}, {pipeline_mode = #tpu.pipeline_mode<synchronous>, transform_indices = @transform_4, window_bounds = array<i64: 1, 32>}, {transform_indices = @transform_5, window_bounds = array<i64: 1, 32, 256>}, {transform_indices = @transform_6, window_bounds = array<i64: 1, 1, 32>}]} {
    %cst = arith.constant 0.000000e+00 : f32
    %0 = vector.broadcast %cst : f32 to vector<1x32xf32>
    %cst_0 = arith.constant 0xFF800000 : f32
    %1 = vector.broadcast %cst_0 : f32 to vector<1x32xf32>
    %c0 = arith.constant 0 : index
    %c0_1 = arith.constant 0 : index
    %c0_2 = arith.constant 0 : index
    %2 = vector.load %arg1[%c0, %c0_1, %c0_2] : memref<1x32x256xf32, #tpu.memory_space<vmem>>, vector<1x32x256xf32>
    %cst_3 = arith.constant dense<0.000000e+00> : vector<1x32xf32>
    %3 = vector.multi_reduction <add>, %2, %cst_3 [2] : vector<1x32x256xf32> to vector<1x32xf32>
    %4 = arith.addf %0, %3 : vector<1x32xf32>
    %cst_4 = arith.constant dense<0xFF800000> : vector<1x32xf32>
    %5 = vector.multi_reduction <maximumf>, %2, %cst_4 [2] : vector<1x32x256xf32> to vector<1x32xf32>
    %6 = arith.maximumf %1, %5 : vector<1x32xf32>
    %cst_5 = arith.constant 3.906250e-03 : f32
    %7 = vector.broadcast %cst_5 : f32 to vector<1x32xf32>
    %8 = arith.mulf %4, %7 : vector<1x32xf32>
    %9 = tpu.concatenate %8, %6 in 0 : vector<1x32xf32>, vector<1x32xf32> -> vector<2x32xf32>
    %c0_6 = arith.constant 0 : index
    %c0_7 = arith.constant 0 : index
    %10 = vector.load %arg2[%c0_6, %c0_7] : memref<32x128xf32, #tpu.memory_space<vmem>>, vector<32x128xf32>
    %cst_8 = arith.constant dense<0.000000e+00> : vector<2x128xf32>
    %11 = tpu.matmul %9, %10, %cst_8 {dimension_numbers = #tpu.dot_dimension_numbers<[1], [0], [0], [1], [0, 0, 1, 1], [], []>, precision = #tpu.contract_precision<fp32>} : vector<2x32xf32>, vector<32x128xf32>, vector<2x128xf32> -> vector<2x128xf32>
    %c0_9 = arith.constant 0 : index
    %c0_10 = arith.constant 0 : index
    %12 = vector.load %arg3[%c0_9, %c0_10] : memref<1x128xf32, #tpu.memory_space<vmem>>, vector<1x128xf32>
    %13 = vector.broadcast %12 : vector<1x128xf32> to vector<2x128xf32>
    %14 = arith.addf %11, %13 : vector<2x128xf32>
    %cst_11 = arith.constant 0.000000e+00 : f32
    %15 = vector.broadcast %cst_11 : f32 to vector<2x128xf32>
    %16 = arith.maximumf %14, %15 : vector<2x128xf32>
    %c0_12 = arith.constant 0 : index
    %c0_13 = arith.constant 0 : index
    %17 = vector.load %arg4[%c0_12, %c0_13] : memref<128x32xf32, #tpu.memory_space<vmem>>, vector<128x32xf32>
    %cst_14 = arith.constant dense<0.000000e+00> : vector<2x32xf32>
    %18 = tpu.matmul %16, %17, %cst_14 {dimension_numbers = #tpu.dot_dimension_numbers<[1], [0], [0], [1], [0, 0, 1, 1], [], []>, precision = #tpu.contract_precision<fp32>} : vector<2x128xf32>, vector<128x32xf32>, vector<2x32xf32> -> vector<2x32xf32>
    %c0_15 = arith.constant 0 : index
    %c0_16 = arith.constant 0 : index
    %19 = vector.load %arg5[%c0_15, %c0_16] : memref<1x32xf32, #tpu.memory_space<vmem>>, vector<1x32xf32>
    %20 = vector.broadcast %19 : vector<1x32xf32> to vector<2x32xf32>
    %21 = arith.addf %18, %20 : vector<2x32xf32>
    %22 = vector.extract_strided_slice %21 {offsets = [0, 0], sizes = [1, 32], strides = [1, 1]} : vector<2x32xf32> to vector<1x32xf32>
    %23 = vector.extract_strided_slice %21 {offsets = [1, 0], sizes = [1, 32], strides = [1, 1]} : vector<2x32xf32> to vector<1x32xf32>
    %24 = arith.addf %22, %23 : vector<1x32xf32>
    %c0_17 = arith.constant 0 : index
    %c0_18 = arith.constant 0 : index
    %c0_19 = arith.constant 0 : index
    %25 = vector.load %arg7[%c0_17, %c0_18, %c0_19] : memref<1x1x32xf32, #tpu.memory_space<vmem>>, vector<1x1x32xf32>
    %26 = vector.shape_cast %25 : vector<1x1x32xf32> to vector<1x32xf32>
    %27 = vector.shape_cast %24 : vector<1x32xf32> to vector<1x1x32xf32>
    tpu.vector_store %arg7[%c0_17, %c0_18, %c0_19], %27 {strides = array<i32>} : memref<1x1x32xf32, #tpu.memory_space<vmem>>, vector<1x1x32xf32>,
    %28 = arith.negf %24 : vector<1x32xf32>
    %29 = math.exp %28 : vector<1x32xf32>
    %cst_20 = arith.constant 1.000000e+00 : f32
    %30 = vector.broadcast %cst_20 : f32 to vector<1x32xf32>
    %31 = arith.addf %30, %29 : vector<1x32xf32>
    %32 = arith.divf %30, %31 : vector<1x32xf32>
    %33 = vector.shape_cast %32 : vector<1x32xf32> to vector<1x32x1xf32>
    %c0_21 = arith.constant 0 : index
    %c0_22 = arith.constant 0 : index
    %c0_23 = arith.constant 0 : index
    %34 = vector.load %arg1[%c0_21, %c0_22, %c0_23] : memref<1x32x256xf32, #tpu.memory_space<vmem>>, vector<1x32x256xf32>
    %35 = vector.broadcast %33 : vector<1x32x1xf32> to vector<1x32x256xf32>
    %36 = arith.mulf %34, %35 : vector<1x32x256xf32>
    %c0_24 = arith.constant 0 : index
    %c0_25 = arith.constant 0 : index
    %c0_26 = arith.constant 0 : index
    %37 = vector.load %arg6[%c0_24, %c0_25, %c0_26] : memref<1x32x256xf32, #tpu.memory_space<vmem>>, vector<1x32x256xf32>
    tpu.vector_store %arg6[%c0_24, %c0_25, %c0_26], %36 {strides = array<i32>} : memref<1x32x256xf32, #tpu.memory_space<vmem>>, vector<1x32x256xf32>,
    return
  }
  func.func @transform_0(%arg0: i32) -> (i32, i32, i32) {
    %c0_i32 = arith.constant 0 : i32
    %c0_i32_0 = arith.constant 0 : i32
    %c0_i32_1 = arith.constant 0 : i32
    return %arg0, %c0_i32, %c0_i32_0 : i32, i32, i32
  }
  func.func @transform_1(%arg0: i32) -> (i32, i32) {
    %c0_i32 = arith.constant 0 : i32
    %c0_i32_0 = arith.constant 0 : i32
    %c0_i32_1 = arith.constant 0 : i32
    return %c0_i32, %c0_i32_0 : i32, i32
  }
  func.func @transform_2(%arg0: i32) -> (i32, i32) {
    %c0_i32 = arith.constant 0 : i32
    %c0_i32_0 = arith.constant 0 : i32
    %c0_i32_1 = arith.constant 0 : i32
    return %c0_i32, %c0_i32_0 : i32, i32
  }
  func.func @transform_3(%arg0: i32) -> (i32, i32) {
    %c0_i32 = arith.constant 0 : i32
    %c0_i32_0 = arith.constant 0 : i32
    %c0_i32_1 = arith.constant 0 : i32
    return %c0_i32, %c0_i32_0 : i32, i32
  }
  func.func @transform_4(%arg0: i32) -> (i32, i32) {
    %c0_i32 = arith.constant 0 : i32
    %c0_i32_0 = arith.constant 0 : i32
    %c0_i32_1 = arith.constant 0 : i32
    return %c0_i32, %c0_i32_0 : i32, i32
  }
  func.func @transform_5(%arg0: i32) -> (i32, i32, i32) {
    %c0_i32 = arith.constant 0 : i32
    %c0_i32_0 = arith.constant 0 : i32
    %c0_i32_1 = arith.constant 0 : i32
    return %arg0, %c0_i32, %c0_i32_0 : i32, i32, i32
  }
  func.func @transform_6(%arg0: i32) -> (i32, i32, i32) {
    %c0_i32 = arith.constant 0 : i32
    %c0_i32_0 = arith.constant 0 : i32
    %c0_i32_1 = arith.constant 0 : i32
    return %arg0, %c0_i32, %c0_i32_0 : i32, i32, i32
  }
}

</mosaic_0001>

<bundles_post_ra>
// kernel: tpu_custom_call.1
= control target key start
LH: loop header
LB: loop body
LE: loop exit
PB: predicated region body
PF: predicated region fallthrough
CT: control target
= control target key end

     0   :  { %12 = vsyncpa [#allocation3], 0  ;;  %s2983_s0 = inlined_call_operand.vmem [shape: f32[2,32,256], index: 0, kind: input, shape index: {}]   ;;  %s2984_s1 = inlined_call_operand.vmem [shape: f32[32,128], index: 1, kind: input, shape index: {}]   ;;  %s2985_s2 = inlined_call_operand.vmem [shape: f32[1,128], index: 2, kind: input, shape index: {}]   ;;  %s2986_s3 = inlined_call_operand.vmem [shape: f32[128,32], index: 3, kind: input, shape index: {}]   ;;  %s2987_s4 = inlined_call_operand.vmem [shape: f32[1,32], index: 4, kind: input, shape index: {}]   ;;  %s2988_s5 = inlined_call_operand.hbm [shape: f32[2,32,256], index: 5, kind: output, shape index: {0}]   ;;  %s2989_s6 = inlined_call_operand.hbm [shape: f32[2,1,32], index: 6, kind: output, shape index: {1}]  }
   0x1   :  { %14 = vsyncpa [#allocation3 + $0x1], 0 }
   0x2   :  { %15 = vsyncpa [#allocation5], 0 }
   0x3   :  { %17 = vsyncpa [#allocation5 + $0x1], 0  ;;  %s2312_s21 = smov 0   ;;  %s2314_s22 = smov 0  }
   0x4   :  { %s2316_s23 = smov 0   ;;  %s2318_s24 = smov 0  }
   0x5 LB: > { %s2333_s25 = sadd.s32 4294967295, %s2269_s24   ;;  %s1699_s26 = sadd.s32 4294967294, %s2269_s24   ;;  %s2269_s24 = sphi %s2318_s24, %s3007_s24   ;;  %s2265_s23 = sphi %s2316_s23, %s3006_s23   ;;  %s2261_s22 = sphi %s2314_s22, %s3005_s22   ;;  %s2257_s21 = sphi %s2312_s21, %s3004_s21  }
   0x6   : > { %s2337_s27 = sadd.s32 1, %s2269_s24   ;;  %s140_s28 = sadd.s32 1, %s2265_s23 }
   0x7   : > { %s137_s29 = ssub.s32 %s2269_s24, %s2337_s27  ;;  %p150_p0 = scmp.ne.s32.totalorder %s2265_s23, %s2261_s22 }
   0x8   : > { %p138_p1 = scmp.eq.s32.totalorder %s137_s29, 0  ;;  %p151_p2 = scmp.eq.s32.totalorder %s2333_s25, 1 }
   0x9   : > { %p156_p3 = scmp.ne.s32.totalorder %s2261_s22, %s2257_s21  ;;  %p157_p4 = scmp.eq.s32.totalorder %s1699_s26, 1 }
   0xa   : > { %s2348_s30 = scalar_select %p138_p1, %s2265_s23, %s140_s28  }
   0xb   : > { %p2350_p5 = por %p151_p2, %p150_p0  ;;  %p2354_p6 = por %p157_p4, %p156_p3 }
   0xc   : > { %p1702_p7 = scmp.ge.s32.totalorder %s2269_s24, 1  ;;  %p221_p8 = scmp.lt.s32.totalorder %s2269_s24, 3 }
   0xe   : > { %p222_p9 = pnand %p1702_p7, %p221_p8 }
   0xf   : > { %p255_p10 = scmp.lt.s32.totalorder (!%p222_p9), %s2333_s25, 1  ;;  %s2905_s16 = sand.u32 (!%p222_p9), 1, %s2261_s22  }
  0x10   : > { %225 = sbr.rel (%p222_p9) target bundleno = 870 (0x366), region = 40  ;;  %s254_s17 = scalar_lea.vmem (!%p222_p9), [#allocation4], %s2905_s16 }
  0x11   : > { %s1712_s18 = sshll.u32 (!%p222_p9), %s2333_s25, 4  ;;  %s1612_s28 = sshll.u32 (!%p222_p9), %s254_s17, 4  ;;  %s1613_s28 = int_to_ptr.vmem [resolvable:$true] %s1612_s28 }
  0x12   : > { %s1610_s26 = scalar_lea.hbm (!%p222_p9), %s2989_s6, %s1712_s18  ;;  %s1584_s29 = scalar_lea.sflag (!%p222_p9), [#allocation5], %s2905_s16 }
  0x15   : > { %s256_s9 = scalar_select %p255_p10, %s2333_s25, 1  ;;  %v361_v16 = vld [vmem:[%s2984_s1 + $0x18] sm:$0xff]  ;;  %v360_v18 = vld [vmem:[%s2984_s1 + $0x10] sm:$0xff]  ;;  %v359_v21 = vld [vmem:[%s2984_s1 + $0x8] sm:$0xff]  ;;  %v2271_v33 = vmov 0.0   ;;  %vm2272_vm0 = vmmov 0   ;;  %v304_v41 = vlaneseq }
  0x16   : > { %v2378_v17 = vand.u32 4294901760, %v361_v16  ;;  %v2386_v20 = vand.u32 4294901760, %v360_v18  ;;  %v2395_v24 = vand.u32 4294901760, %v359_v21  ;;  %v358_v25 = vld [vmem:[%s2984_s1] sm:$0xff]  ;;  %1860 = vmatprep.subr.mxu1 %v2271_v33  ;;  %1849 = vmatprep.subr.mxu0 %v2271_v33  ;;  %vm315_vm1 = vcmask 130112  }
  0x17   : > { %s1715_s10 = sshll.u32 %s256_s9, 6  ;;  %v2407_v29 = vand.u32 4294901760, %v358_v25  ;;  %1868 = vmatprep.mubr.msk.f32.mxu1 %vm2272_vm0, %v2271_v33  ;;  %1857 = vmatprep.mubr.msk.f32.mxu0 %vm2272_vm0, %v2271_v33  ;;  %v305_v42 = vand.u32 127, %v304_v41  ;;  %v2441_v45 = vshrl.u32 %v304_v41, 7  ;;  %vm322_vm2 = vcmask 195712   ;;  %v869_v41 = vld [vmem:[%s2986_s3 + $0x50] sm:$0xff] }
  0x18   : > { %s2365_s13 = scalar_lea.vmem %s2983_s0, %s1715_s10  ;;  %v2384_v19 = vsub.f32 %v361_v16, %v2378_v17  ;;  %v2393_v23 = vsub.f32 %v360_v18, %v2386_v20  ;;  %v2405_v28 = vsub.f32 %v359_v21, %v2395_v24  ;;  %1850 = vmatpush3.msra.mxu0 %v2378_v17  ;;  %vm329_vm3 = vcmask 261312   ;;  %s2179_s9 = scalar_lea.vmem %s1613_s28, 16 }
  0x19   : > { %v264_v0 = vld [vmem:[%s2365_s13 + $0x20] sm:$0xff]  ;;  %v265_v1 = vld [vmem:[%s2365_s13 + $0x28] sm:$0xff]  ;;  %v266_v5 = vld [vmem:[%s2365_s13 + $0x30] sm:$0xff]  ;;  %v2415_v34 = vsub.f32 %v358_v25, %v2407_v29  ;;  %1851 = vmatprep.subr.mxu0 %v2271_v33  ;;  %v310_v44 = vadd.s32 4294967288, %v305_v42  ;;  %v317_v47 = vadd.s32 4294967280, %v305_v42  ;;  %v308_v50 = vsub.s32 %v305_v42, %v2441_v45  ;;  %p2180_p11 = scmp.ne.s32.totalorder %s1613_s28, %s2179_s9  ;;  %s2273_s10 = smov [#allocation4]  }
  0x1a   : > { %v260_v2 = vld [vmem:[%s2365_s13] sm:$0xff]  ;;  %v274_v3 = vadd.f32 %v265_v1, %v264_v0  ;;  %v261_v4 = vld [vmem:[%s2365_s13 + $0x8] sm:$0xff]  ;;  %v267_v6 = vld [vmem:[%s2365_s13 + $0x38] sm:$0xff]  ;;  %v290_v15 = vmax.f32 %v264_v0, %v265_v1  ;;  %v479_v22 = vand.u32 4294901760, %v2384_v19  ;;  %v486_v27 = vand.u32 4294901760, %v2393_v23  ;;  %1852 = vmatpush3.msra.mxu0 %v2386_v20  ;;  %s2183_s11 = sshll.u32 %s2273_s10, 4  ;;  %s2184_s11 = int_to_ptr.vmem [resolvable:$false] %s2183_s11 }
  0x1b   : > { %v268_v7 = vadd.f32 %v261_v4, %v260_v2  ;;  %v262_v8 = vld [vmem:[%s2365_s13 + $0x10] sm:$0xff]  ;;  %v263_v9 = vld [vmem:[%s2365_s13 + $0x18] sm:$0xff]  ;;  %v277_v10 = vadd.f32 %v267_v6, %v266_v5  ;;  %v284_v13 = vmax.f32 %v260_v2, %v261_v4  ;;  %v293_v14 = vmax.f32 %v266_v5, %v267_v6  ;;  %1853 = vmatprep.subr.mxu0 %v2271_v33  ;;  %p2181_p12 = pnand %p2180_p11, %p2350_p5  ;;  %s2185_s12 = scalar_lea.vmem %s2184_s11, 32 }
  0x1c   : > { %275 = vadd.xlane.f32.xlu1 %v274_v3  ;;  %v271_v11 = vadd.f32 %v263_v9, %v262_v8  ;;  %v287_v12 = vmax.f32 %v262_v8, %v263_v9  ;;  %v480_v26 = vsub.f32 %v2384_v19, %v479_v22  ;;  %v487_v31 = vsub.f32 %v2393_v23, %v486_v27  ;;  %p2186_p0 = scmp.lt.s32.totalorder %s1613_s28, %s2184_s11  ;;  %p2187_p1 = scmp.lt.s32.totalorder %s2185_s12, %s2179_s9 }
  0x1d   : > { %269 = vadd.xlane.f32.xlu0 %v268_v7  ;;  %v493_v32 = vand.u32 4294901760, %v2405_v28  ;;  %v500_v37 = vand.u32 4294901760, %v2415_v34  ;;  %1854 = vmatpush3.msra.mxu0 %v2395_v24  ;;  %v313_v49 = vsub.s32 %v310_v44, %v2441_v45  ;;  %v324_v52 = vadd.s32 4294967272, %v305_v42  ;;  %p2182_p13 = pneg %p2181_p12 }
  0x1e   : > { %v481_v30 = vand.u32 4294901760, %v480_v26  ;;  %v488_v35 = vand.u32 4294901760, %v487_v31  ;;  %1855 = vmatprep.subr.mxu0 %v2271_v33  ;;  %v320_v55 = vsub.s32 %v317_v47, %v2441_v45  ;;  %vm356_vm4 = vcmask 1040384   ;;  %p2188_p2 = por %p2187_p1, %p2186_p0 }
  0x1f   : > { %v494_v36 = vsub.f32 %v2405_v28, %v493_v32  ;;  %v501_v39 = vsub.f32 %v2415_v34, %v500_v37  ;;  %1856 = vmatpush3.msra.mxu0 %v2407_v29  ;;  %v327_v60 = vsub.s32 %v324_v52, %v2441_v45  ;;  %vm369_vm5 = vcmask 261120  }
  0x20   : > { %278 = vadd.xlane.f32.xlu1 %v277_v10  ;;  %1861 = vmatpush3.msra.mxu1 %v481_v30  ;;  %vm1527_vm6 = vcmask 253952   ;;  %p2189_p3 = pnand %p2188_p2, %p2182_p13 }
  0x21   : > { %272 = vadd.xlane.f32.xlu0 %v271_v11  ;;  %1862 = vmatprep.subr.mxu1 %v2271_v33  ;;  %v495_v38 = vand.u32 4294901760, %v494_v36  ;;  %v502_v40 = vand.u32 4294901760, %v501_v39 }
  0x22   : > { %1863 = vmatpush3.msra.mxu1 %v488_v35  ;;  %1871 = vmatprep.subr.mxu0 %v2271_v33  ;;  %v870_v35 = vld [vmem:[%s2986_s3 + $0x58] sm:$0xff] }
  0x23   : > { %1864 = vmatprep.subr.mxu1 %v2271_v33 }
  0x24   : > { %288 = vmax.xlane.f32.xlu1 %v287_v12  ;;  %1865 = vmatpush3.msra.mxu1 %v495_v38 }
  0x25   : > { %285 = vmax.xlane.f32.xlu0 %v284_v13  ;;  %1866 = vmatprep.subr.mxu1 %v2271_v33 }
  0x26   : > { %1867 = vmatpush3.msra.mxu1 %v502_v40  ;;  %v2548_v40 = vand.u32 4294901760, %v870_v35 }
  0x27   : > { %1882 = vmatprep.subr.mxu1 %v2271_v33 }
  0x28   : > { %294 = vmax.xlane.f32.xlu1 %v293_v14  ;;  %v2562_v47 = vsub.f32 %v870_v35, %v2548_v40 }
  0x29   : > { %291 = vmax.xlane.f32.xlu0 %v290_v15 }
  0xa5   : > { %v276_v43 = vpop.xlane.xlu1 %275 }
  0xa6   : > { %v270_v46 = vpop.xlane.xlu0 %269  ;;  %v298_v56 = vmul.f32 0.00390625, %v276_v43 }
  0xa7   : > { %v296_v51 = vmul.f32 0.00390625, %v270_v46  ;;  %v2558_v46 = vand.u32 4294901760, %v869_v41 }
  0xa8   : > { %v321_v2 = vrot.slane %v298_v56, %v320_v55 }
  0xa9   : > { %v279_v48 = vpop.xlane.xlu1 %278  ;;  %v309_v59 = vrot.slane %v296_v51, %v308_v50  ;;  %v2572_v51 = vsub.f32 %v869_v41, %v2558_v46 }
  0xaa   : > { %v273_v53 = vpop.xlane.xlu0 %272  ;;  %v299_v61 = vmul.f32 0.00390625, %v279_v48  ;;  %v868_v48 = vld [vmem:[%s2986_s3 + $0x48] sm:$0xff] }
  0xab   : > { %v297_v54 = vmul.f32 0.00390625, %v273_v53  ;;  %v2574_v52 = vand.u32 4294901760, %v868_v48  ;;  %v1004_v53 = vand.u32 4294901760, %v2562_v47  ;;  %v1011_v56 = vand.u32 4294901760, %v2572_v51 }
  0xac   : > { %v328_v4 = vrot.slane %v299_v61, %v327_v60 }
  0xad   : > { %v314_v57 = vrot.slane %v297_v54, %v313_v49  ;;  %v289_v58 = vpop.xlane.xlu1 %288  ;;  %v867_v54 = vld [vmem:[%s2986_s3 + $0x40] sm:$0xff]  ;;  %v1012_v61 = vsub.f32 %v2572_v51, %v1011_v56 }
  0xae   : > { %v286_v62 = vpop.xlane.xlu0 %285  ;;  %v343_v0 = vrot.slane %v289_v58, %v313_v49  ;;  %v2587_v58 = vand.u32 4294901760, %v867_v54 }
  0xaf   : > { %v316_v63 = vsel %vm315_vm1, %v314_v57, %v309_v59  ;;  %v339_v1 = vrot.slane %v286_v62, %v308_v50  ;;  %v2585_v57 = vsub.f32 %v868_v48, %v2574_v52  ;;  %v1005_v59 = vsub.f32 %v2562_v47, %v1004_v53 }
  0xb0   : > { %v323_v7 = vsel %vm322_vm2, %v321_v2, %v316_v63  ;;  %v2603_v63 = vsub.f32 %v867_v54, %v2587_v58  ;;  %v865_v2 = vld [vmem:[%s2986_s3 + $0x30] sm:$0xff] }
  0xb1   : > { %v295_v3 = vpop.xlane.xlu1 %294  ;;  %v344_v9 = vsel %vm315_vm1, %v343_v0, %v339_v1  ;;  %v330_v11 = vsel %vm329_vm3, %v328_v4, %v323_v7  ;;  %v1018_v62 = vand.u32 4294901760, %v2585_v57  ;;  %v1006_v1 = vand.u32 4294901760, %v1005_v59 }
  0xb2   : > { %v292_v5 = vpop.xlane.xlu0 %291  ;;  %v353_v6 = vrot.slane %v295_v3, %v327_v60  ;;  %v866_v60 = vld [vmem:[%s2986_s3 + $0x38] sm:$0xff]  ;;  %v1013_v3 = vand.u32 4294901760, %v1012_v61  ;;  %v2621_v7 = vand.u32 4294901760, %v865_v2  ;;  %v859_v61 = vld [vmem:[%s2986_s3] sm:$0xff] }
  0xb3   : > { %v348_v8 = vrot.slane %v292_v5, %v320_v55  ;;  %v2605_v0 = vand.u32 4294901760, %v866_v60  ;;  %v1019_v4 = vsub.f32 %v2585_v57, %v1018_v62  ;;  %v1025_v5 = vand.u32 4294901760, %v2603_v63 }
  0xb5   : > { %v349_v10 = vsel %vm322_vm2, %v348_v8, %v344_v9  ;;  %v864_v8 = vld [vmem:[%s2986_s3 + $0x28] sm:$0xff]  ;;  %v1020_v9 = vand.u32 4294901760, %v1019_v4  ;;  %v2707_v4 = vand.u32 4294901760, %v859_v61 }
  0xb6   : > { %v354_v12 = vsel %vm329_vm3, %v353_v6, %v349_v10  ;;  %v2618_v6 = vsub.f32 %v866_v60, %v2605_v0  ;;  %v1026_v10 = vsub.f32 %v2603_v63, %v1025_v5 }
  0xb7   : > { %v357_v13 = vsel %vm356_vm4, %v330_v11, %v354_v12  ;;  %v2632_v12 = vand.u32 4294901760, %v864_v8 }
  0xb8   : > { %v371_v14 = vsel %vm369_vm5, %v357_v13, 0  ;;  %v1032_v11 = vand.u32 4294901760, %v2618_v6  ;;  %v2636_v13 = vsub.f32 %v865_v2, %v2621_v7 }
  0xb9   : > { %v442_v15 = vand.u32 4294901760, %v371_v14 }
  0xbb   : > { %1869 = vmatmul.mubr.f32.vlgmr.msra.gmra.mxu1 %v442_v15  ;;  %v443_v16 = vsub.f32 %v371_v14, %v442_v15  ;;  %v863_v14 = vld [vmem:[%s2986_s3 + $0x20] sm:$0xff] }
  0xbc   : > { %1883 = vmatpush3.msra.mxu1 %v2378_v17  ;;  %1890 = vmatprep.mubr.msk.f32.mxu1 %vm2272_vm0, %v2271_v33 }
  0xbd   : > { %1884 = vmatprep.subr.mxu1 %v2271_v33  ;;  %v444_v18 = vand.u32 4294901760, %v443_v16 }
  0xbe   : > { %1885 = vmatpush3.msra.mxu1 %v2386_v20 }
  0xbf   : > { %1886 = vmatprep.subr.mxu1 %v2271_v33  ;;  %v445_v21 = vsub.f32 %v443_v16, %v444_v18 }
  0xc0   : > { %1887 = vmatpush3.msra.mxu1 %v2395_v24 }
  0xc1   : > { %1888 = vmatprep.subr.mxu1 %v2271_v33  ;;  %v446_v25 = vand.u32 4294901760, %v445_v21  ;;  %v2649_v21 = vand.u32 4294901760, %v863_v14 }
  0xc2   : > { %1889 = vmatpush3.msra.mxu1 %v2407_v29 }
  0xc3   : > { %1891 = vmatmul.mubr.f32.vlgmr.msra.gmra.mxu1 %v444_v18  ;;  %1904 = vmatprep.subr.mxu1 %v2271_v33  ;;  %v2647_v18 = vsub.f32 %v864_v8, %v2632_v12 }
  0xc4   : > { %1858 = vmatmul.mubr.f32.vlgmr.msra.gmra.mxu0 %v446_v25  ;;  %1905 = vmatpush3.msra.mxu1 %v2378_v17  ;;  %v874_v17 = vld [vmem:[%s2986_s3 + $0x78] sm:$0xff]  ;;  %v1039_v25 = vand.u32 4294901760, %v2636_v13 }
  0xc5   : > { %1872 = vmatpush3.msra.mxu0 %v2384_v19  ;;  %1906 = vmatprep.subr.mxu1 %v2271_v33  ;;  %v2500_v19 = vand.u32 4294901760, %v874_v17 }
  0xc6   : > { %1873 = vmatprep.subr.mxu0 %v2271_v33  ;;  %1907 = vmatpush3.msra.mxu1 %v2386_v20  ;;  %v873_v20 = vld [vmem:[%s2986_s3 + $0x70] sm:$0xff]  ;;  %v1040_v35 = vsub.f32 %v2636_v13, %v1039_v25 }
  0xc7   : > { %1874 = vmatpush3.msra.mxu0 %v2393_v23  ;;  %1908 = vmatprep.subr.mxu1 %v2271_v33  ;;  %v2508_v23 = vand.u32 4294901760, %v873_v20 }
  0xc8   : > { %1875 = vmatprep.subr.mxu0 %v2271_v33  ;;  %1909 = vmatpush3.msra.mxu1 %v2395_v24  ;;  %v872_v24 = vld [vmem:[%s2986_s3 + $0x68] sm:$0xff]  ;;  %v1041_v48 = vand.u32 4294901760, %v1040_v35 }
  0xc9   : > { %1876 = vmatpush3.msra.mxu0 %v2405_v28  ;;  %1910 = vmatprep.subr.mxu1 %v2271_v33  ;;  %v2519_v28 = vand.u32 4294901760, %v872_v24 }
  0xca   : > { %1877 = vmatprep.subr.mxu0 %v2271_v33  ;;  %1879 = vmatprep.mubr.msk.f32.mxu0 %vm2272_vm0, %v2271_v33 }
  0xcb   : > { %1878 = vmatpush3.msra.mxu0 %v2415_v34  ;;  %1911 = vmatpush3.msra.mxu1 %v2407_v29  ;;  %v871_v29 = vld [vmem:[%s2986_s3 + $0x60] sm:$0xff] }
  0xcc   : > { %1912 = vmatprep.mubr.msk.f32.mxu1 %vm2272_vm0, %v2271_v33  ;;  %1880 = vmatmul.mubr.f32.vlgmr.msra.gmra.mxu0 %v443_v16  ;;  %v2533_v34 = vand.u32 4294901760, %v871_v29  ;;  %v1033_v16 = vsub.f32 %v2618_v6, %v1032_v11 }
  0xcd   : > { %1893 = vmatprep.subr.mxu0 %v2271_v33  ;;  %1913 = vmatmul.mubr.f32.vlgmr.msra.gmra.mxu1 %v442_v15 }
  0xce   : > { %1894 = vmatpush3.msra.mxu0 %v479_v22  ;;  %1901 = vmatprep.mubr.msk.f32.mxu0 %vm2272_vm0, %v2271_v33  ;;  %v2506_v22 = vsub.f32 %v874_v17, %v2500_v19  ;;  %v2545_v39 = vsub.f32 %v871_v29, %v2533_v34  ;;  %v862_v17 = vld [vmem:[%s2986_s3 + $0x18] sm:$0xff]  ;;  %v2660_v29 = vsub.f32 %v863_v14, %v2649_v21 }
  0xcf   : > { %1895 = vmatprep.subr.mxu0 %v2271_v33  ;;  %1950 = vmatprep.subr.mxu1 %v2271_v33  ;;  %v2719_v14 = vsub.f32 %v859_v61, %v2707_v4 }
  0xd0   : > { %1896 = vmatpush3.msra.mxu0 %v486_v27  ;;  %1982 = vmatprep.mubr.msk.f32.mxu1 %vm2272_vm0, %v2271_v33  ;;  %v976_v26 = vand.u32 4294901760, %v2506_v22  ;;  %v2517_v27 = vsub.f32 %v873_v20, %v2508_v23  ;;  %v997_v44 = vand.u32 4294901760, %v2545_v39  ;;  %v1034_v20 = vand.u32 4294901760, %v1033_v16 }
  0xd1   : > { %1897 = vmatprep.subr.mxu0 %v2271_v33  ;;  %v2994_v41 = vand.u32 4294901760, %v2660_v29 }
  0xd2   : > { %1898 = vmatpush3.msra.mxu0 %v493_v32  ;;  %v977_v30 = vsub.f32 %v2506_v22, %v976_v26  ;;  %v983_v31 = vand.u32 4294901760, %v2517_v27  ;;  %v2531_v32 = vsub.f32 %v872_v24, %v2519_v28  ;;  %v998_v50 = vsub.f32 %v2545_v39, %v997_v44 }
  0xd3   : > { %1899 = vmatprep.subr.mxu0 %v2271_v33  ;;  %v2995_v24 = vand.u32 4294901760, %v2647_v18  ;;  %v1054_v54 = vsub.f32 %v2660_v29, %v2994_v41 }
  0xd4   : > { %1900 = vmatpush3.msra.mxu0 %v500_v37  ;;  %v978_v36 = vand.u32 4294901760, %v977_v30  ;;  %v984_v37 = vsub.f32 %v2517_v27, %v983_v31  ;;  %v990_v38 = vand.u32 4294901760, %v2531_v32  ;;  %v999_v55 = vand.u32 4294901760, %v998_v50 }
  0xd5   : > { %1902 = vmatmul.mubr.f32.vlgmr.msra.gmra.mxu0 %v442_v15  ;;  %1915 = vmatprep.subr.mxu0 %v2271_v33  ;;  %v1027_v15 = vand.u32 4294901760, %v1026_v10  ;;  %v2662_v30 = vand.u32 4294901760, %v862_v17 }
  0xd6   : > { %1947 = vmatprep.mubr.msk.f32.mxu0 %vm2272_vm0, %v2271_v33  ;;  %1916 = vmatpush3.msra.mxu0 %v2500_v19  ;;  %v985_v42 = vand.u32 4294901760, %v984_v37  ;;  %v991_v43 = vsub.f32 %v2531_v32, %v990_v38  ;;  %v1047_v37 = vsub.f32 %v2647_v18, %v2995_v24 }
  0xd7   : > { %1917 = vmatprep.subr.mxu0 %v2271_v33  ;;  %1951 = vmatpush3.msra.mxu1 %v978_v36  ;;  %v861_v36 = vld [vmem:[%s2986_s3 + $0x10] sm:$0xff] }
  0xd8   : > { %1918 = vmatpush3.msra.mxu0 %v2508_v23  ;;  %1952 = vmatprep.subr.mxu1 %v2271_v33  ;;  %v992_v49 = vand.u32 4294901760, %v991_v43  ;;  %v2680_v43 = vand.u32 4294901760, %v861_v36  ;;  %v1048_v50 = vand.u32 4294901760, %v1047_v37 }
  0xd9   : > { %1919 = vmatprep.subr.mxu0 %v2271_v33  ;;  %1953 = vmatpush3.msra.mxu1 %v985_v42  ;;  %v2678_v42 = vsub.f32 %v862_v17, %v2662_v30  ;;  %v2990_v17 = vand.u32 4294901760, %v2719_v14 }
  0xda   : > { %1920 = vmatpush3.msra.mxu0 %v2519_v28  ;;  %1954 = vmatprep.subr.mxu1 %v2271_v33  ;;  %v2693_v59 = vsub.f32 %v861_v36, %v2680_v43 }
  0xdb   : > { %1921 = vmatprep.subr.mxu0 %v2271_v33  ;;  %1955 = vmatpush3.msra.mxu1 %v992_v49  ;;  %v860_v49 = vld [vmem:[%s2986_s3 + $0x8] sm:$0xff]  ;;  %v1082_v35 = vsub.f32 %v2719_v14, %v2990_v17 }
  0xdc   : > { %1922 = vmatpush3.msra.mxu0 %v2533_v34  ;;  %1956 = vmatprep.subr.mxu1 %v2271_v33  ;;  %v2696_v60 = vand.u32 4294901760, %v860_v49 }
  0xdd   : > { %1923 = vmatprep.subr.mxu0 %v2271_v33  ;;  %1957 = vmatpush3.msra.mxu1 %v999_v55  ;;  %v2993_v55 = vand.u32 4294901760, %v2678_v42  ;;  %v1083_v37 = vand.u32 4294901760, %v1082_v35 }
  0xde   : > { %1924 = vmatpush3.msra.mxu0 %v2548_v40  ;;  %1958 = vmatprep.subr.mxu1 %v2271_v33  ;;  %v2711_v8 = vsub.f32 %v860_v49, %v2696_v60 }
  0xdf   : > { %1925 = vmatprep.subr.mxu0 %v2271_v33  ;;  %1959 = vmatpush3.msra.mxu1 %v1006_v1  ;;  %v1055_v1 = vand.u32 4294901760, %v1054_v54  ;;  %v1061_v2 = vsub.f32 %v2678_v42, %v2993_v55 }
  0xe0   : > { %1926 = vmatpush3.msra.mxu0 %v2558_v46  ;;  %1960 = vmatprep.subr.mxu1 %v2271_v33 }
  0xe1   : > { %1927 = vmatprep.subr.mxu0 %v2271_v33  ;;  %1961 = vmatpush3.msra.mxu1 %v1013_v3  ;;  %v2992_v3 = vand.u32 4294901760, %v2693_v59 }
  0xe2   : > { %1928 = vmatpush3.msra.mxu0 %v2574_v52  ;;  %1962 = vmatprep.subr.mxu1 %v2271_v33 }
  0xe3   : > { %1929 = vmatprep.subr.mxu0 %v2271_v33  ;;  %1963 = vmatpush3.msra.mxu1 %v1020_v9  ;;  %v1062_v9 = vand.u32 4294901760, %v1061_v2  ;;  %v1068_v10 = vsub.f32 %v2693_v59, %v2992_v3  ;;  %v1706_v2 = vld [vmem:[%s2985_s2] ss:$0 sm:$0xff] }
  0xe4   : > { %1930 = vmatpush3.msra.mxu0 %v2587_v58  ;;  %1964 = vmatprep.subr.mxu1 %v2271_v33 }
  0xe5   : > { %1931 = vmatprep.subr.mxu0 %v2271_v33  ;;  %1965 = vmatpush3.msra.mxu1 %v1027_v15  ;;  %v2991_v15 = vand.u32 4294901760, %v2711_v8  ;;  %v1069_v16 = vand.u32 4294901760, %v1068_v10 }
  0xe6   : > { %1932 = vmatpush3.msra.mxu0 %v2605_v0  ;;  %1966 = vmatprep.subr.mxu1 %v2271_v33 }
  0xe7   : > { %1933 = vmatprep.subr.mxu0 %v2271_v33  ;;  %1967 = vmatpush3.msra.mxu1 %v1034_v20  ;;  %v1075_v20 = vsub.f32 %v2711_v8, %v2991_v15 }
  0xe8   : > { %1934 = vmatpush3.msra.mxu0 %v2621_v7  ;;  %1968 = vmatprep.subr.mxu1 %v2271_v33 }
  0xe9   : > { %1935 = vmatprep.subr.mxu0 %v2271_v33  ;;  %1969 = vmatpush3.msra.mxu1 %v1041_v48  ;;  %v1076_v36 = vand.u32 4294901760, %v1075_v20 }
  0xea   : > { %1936 = vmatpush3.msra.mxu0 %v2632_v12  ;;  %1970 = vmatprep.subr.mxu1 %v2271_v33 }
  0xeb   : > { %1937 = vmatprep.subr.mxu0 %v2271_v33  ;;  %1971 = vmatpush3.msra.mxu1 %v1048_v50 }
  0xec   : > { %1938 = vmatpush3.msra.mxu0 %v2649_v21  ;;  %1972 = vmatprep.subr.mxu1 %v2271_v33 }
  0xed   : > { %1939 = vmatprep.subr.mxu0 %v2271_v33  ;;  %1973 = vmatpush3.msra.mxu1 %v1055_v1 }
  0xee   : > { %1940 = vmatpush3.msra.mxu0 %v2662_v30  ;;  %1974 = vmatprep.subr.mxu1 %v2271_v33 }
  0xef   : > { %1941 = vmatprep.subr.mxu0 %v2271_v33  ;;  %1975 = vmatpush3.msra.mxu1 %v1062_v9 }
  0xf0   : > { %1942 = vmatpush3.msra.mxu0 %v2680_v43  ;;  %1976 = vmatprep.subr.mxu1 %v2271_v33 }
  0xf1   : > { %1943 = vmatprep.subr.mxu0 %v2271_v33  ;;  %1977 = vmatpush3.msra.mxu1 %v1069_v16 }
  0xf2   : > { %1944 = vmatpush3.msra.mxu0 %v2696_v60  ;;  %1978 = vmatprep.subr.mxu1 %v2271_v33 }
  0xf3   : > { %1945 = vmatprep.subr.mxu0 %v2271_v33  ;;  %1979 = vmatpush3.msra.mxu1 %v1076_v36 }
  0xf4   : > { %1946 = vmatpush3.msra.mxu0 %v2707_v4  ;;  %1980 = vmatprep.subr.mxu1 %v2271_v33 }
  0xf5   : > { %1985 = vmatprep.subr.mxu0 %v2271_v33  ;;  %1981 = vmatpush3.msra.mxu1 %v1083_v37 }
  0xf6   : > { %2020 = vmatprep.subr.mxu1 %v2271_v33 }
 0x17b   : > { %v539_v48 = vpop.f32.mrf.mxu1 }
 0x17d   : > { %v1870_v49 = vpop.f32.mrf.mxu1 }
 0x183   : > { %v696_v50 = vpop.f32.mrf.mxu1 }
 0x184   : > { %v448_v54 = vpop.f32.mrf.mxu0 }
 0x185   : > { %v1892_v61 = vpop.f32.mrf.mxu1  ;;  %v449_v9 = vadd.f32 %v1706_v2, %v448_v54 }
 0x186   : > { %v1859_v1 = vpop.f32.mrf.mxu0 }
 0x187   : > { %v540_v20 = vadd.f32 %v539_v48, %v449_v9 }
 0x18c   : > { %v619_v10 = vpop.f32.mrf.mxu0 }
 0x18d   : > { %v854_v16 = vpop.f32.mrf.mxu1  ;;  %v620_v17 = vadd.f32 %v619_v10, %v540_v20 }
 0x18e   : > { %v1881_v35 = vpop.f32.mrf.mxu0 }
 0x18f   : > { %v1914_v36 = vpop.f32.mrf.mxu1  ;;  %v697_v37 = vadd.f32 %v696_v50, %v620_v17 }
 0x195   : > { %v779_v15 = vpop.f32.mrf.mxu0 }
 0x196   : > { %v780_v3 = vadd.f32 %v779_v15, %v697_v37 }
 0x197   : > { %v1903_v55 = vpop.f32.mrf.mxu0 }
 0x198   : > { %v855_v49 = vadd.f32 %v854_v16, %v780_v3 }
 0x19a   : > { %v858_v41 = vmax.f32 %v855_v49, 0.0 }
 0x19c   : > { %v2740_v24 = vand.u32 4294901760, %v858_v41 }
 0x19e   : > { %v2743_v61 = vsub.f32 %v858_v41, %v2740_v24  ;;  %1983 = vmatmul.mubr.f32.vlgmr.msra.gmra.mxu1 %v2740_v24 }
 0x19f   : > { %2021 = vmatpush3.msra.mxu1 %v2500_v19  ;;  %2052 = vmatprep.mubr.msk.f32.mxu1 %vm2272_vm0, %v2271_v33 }
 0x1a0   : > { %v965_v48 = vand.u32 4294901760, %v2743_v61  ;;  %2022 = vmatprep.subr.mxu1 %v2271_v33 }
 0x1a1   : > { %2023 = vmatpush3.msra.mxu1 %v2508_v23 }
 0x1a2   : > { %2024 = vmatprep.subr.mxu1 %v2271_v33  ;;  %v966_v55 = vsub.f32 %v2743_v61, %v965_v48 }
 0x1a3   : > { %2025 = vmatpush3.msra.mxu1 %v2519_v28 }
 0x1a4   : > { %2026 = vmatprep.subr.mxu1 %v2271_v33  ;;  %v967_v41 = vand.u32 4294901760, %v966_v55 }
 0x1a5   : > { %2027 = vmatpush3.msra.mxu1 %v2533_v34 }
 0x1a6   : > { %2028 = vmatprep.subr.mxu1 %v2271_v33  ;;  %1948 = vmatmul.mubr.f32.vlgmr.msra.gmra.mxu0 %v967_v41 }
 0x1a7   : > { %1986 = vmatpush3.msra.mxu0 %v2506_v22  ;;  %2029 = vmatpush3.msra.mxu1 %v2548_v40  ;;  %v2999_v22 = vand.u32 4294901760, %v2660_v29 }
 0x1a8   : > { %1987 = vmatprep.subr.mxu0 %v2271_v33  ;;  %2030 = vmatprep.subr.mxu1 %v2271_v33 }
 0x1a9   : > { %1988 = vmatpush3.msra.mxu0 %v2517_v27  ;;  %2031 = vmatpush3.msra.mxu1 %v2558_v46  ;;  %v3002_v27 = vand.u32 4294901760, %v2711_v8 }
 0x1aa   : > { %1989 = vmatprep.subr.mxu0 %v2271_v33  ;;  %2032 = vmatprep.subr.mxu1 %v2271_v33 }
 0x1ab   : > { %1990 = vmatpush3.msra.mxu0 %v2531_v32  ;;  %2033 = vmatpush3.msra.mxu1 %v2574_v52 }
 0x1ac   : > { %1991 = vmatprep.subr.mxu0 %v2271_v33  ;;  %2034 = vmatprep.subr.mxu1 %v2271_v33 }
 0x1ad   : > { %1992 = vmatpush3.msra.mxu0 %v2545_v39  ;;  %2035 = vmatpush3.msra.mxu1 %v2587_v58 }
 0x1ae   : > { %1993 = vmatprep.subr.mxu0 %v2271_v33  ;;  %2036 = vmatprep.subr.mxu1 %v2271_v33 }
 0x1af   : > { %1994 = vmatpush3.msra.mxu0 %v2562_v47  ;;  %2037 = vmatpush3.msra.mxu1 %v2605_v0  ;;  %v1707_v47 = vld [vmem:[%s2987_s4] ss:$0 sm:$0xff] }
 0x1b0   : > { %1995 = vmatprep.subr.mxu0 %v2271_v33  ;;  %2038 = vmatprep.subr.mxu1 %v2271_v33 }
 0x1b1   : > { %1996 = vmatpush3.msra.mxu0 %v2572_v51  ;;  %2039 = vmatpush3.msra.mxu1 %v2621_v7 }
 0x1b2   : > { %1997 = vmatprep.subr.mxu0 %v2271_v33  ;;  %2040 = vmatprep.subr.mxu1 %v2271_v33 }
 0x1b3   : > { %1998 = vmatpush3.msra.mxu0 %v2585_v57  ;;  %2041 = vmatpush3.msra.mxu1 %v2632_v12 }
 0x1b4   : > { %1999 = vmatprep.subr.mxu0 %v2271_v33  ;;  %2042 = vmatprep.subr.mxu1 %v2271_v33 }
 0x1b5   : > { %2000 = vmatpush3.msra.mxu0 %v2603_v63  ;;  %2043 = vmatpush3.msra.mxu1 %v2649_v21 }
 0x1b6   : > { %2001 = vmatprep.subr.mxu0 %v2271_v33  ;;  %2044 = vmatprep.subr.mxu1 %v2271_v33 }
 0x1b7   : > { %2002 = vmatpush3.msra.mxu0 %v2618_v6  ;;  %2045 = vmatpush3.msra.mxu1 %v2662_v30 }
 0x1b8   : > { %2003 = vmatprep.subr.mxu0 %v2271_v33  ;;  %2046 = vmatprep.subr.mxu1 %v2271_v33 }
 0x1b9   : > { %2004 = vmatpush3.msra.mxu0 %v2636_v13  ;;  %2047 = vmatpush3.msra.mxu1 %v2680_v43  ;;  %v1537_v13 = vsub.s32 0, %v2441_v45 }
 0x1ba   : > { %2005 = vmatprep.subr.mxu0 %v2271_v33  ;;  %2048 = vmatprep.subr.mxu1 %v2271_v33 }
 0x1bb   : > { %2006 = vmatpush3.msra.mxu0 %v2647_v18  ;;  %2049 = vmatpush3.msra.mxu1 %v2696_v60 }
 0x1bc   : > { %2007 = vmatprep.subr.mxu0 %v2271_v33  ;;  %2050 = vmatprep.subr.mxu1 %v2271_v33 }
 0x1bd   : > { %2008 = vmatpush3.msra.mxu0 %v2660_v29  ;;  %2051 = vmatpush3.msra.mxu1 %v2707_v4 }
 0x1be   : > { %2009 = vmatprep.subr.mxu0 %v2271_v33  ;;  %2053 = vmatmul.mubr.f32.vlgmr.msra.gmra.mxu1 %v965_v48 }
 0x1bf   : > { %2090 = vmatprep.subr.mxu1 %v2271_v33  ;;  %2010 = vmatpush3.msra.mxu0 %v2678_v42 }
 0x1c0   : > { %2091 = vmatpush3.msra.mxu1 %v2500_v19  ;;  %2011 = vmatprep.subr.mxu0 %v2271_v33  ;;  %v2998_v19 = vand.u32 4294901760, %v2647_v18 }
 0x1c1   : > { %2092 = vmatprep.subr.mxu1 %v2271_v33  ;;  %2012 = vmatpush3.msra.mxu0 %v2693_v59 }
 0x1c2   : > { %2093 = vmatpush3.msra.mxu1 %v2508_v23  ;;  %2013 = vmatprep.subr.mxu0 %v2271_v33  ;;  %v3000_v23 = vand.u32 4294901760, %v2678_v42 }
 0x1c3   : > { %2094 = vmatprep.subr.mxu1 %v2271_v33  ;;  %2014 = vmatpush3.msra.mxu0 %v2711_v8 }
 0x1c4   : > { %2095 = vmatpush3.msra.mxu1 %v2519_v28  ;;  %2015 = vmatprep.subr.mxu0 %v2271_v33  ;;  %v3003_v28 = vand.u32 4294901760, %v2719_v14 }
 0x1c5   : > { %2096 = vmatprep.subr.mxu1 %v2271_v33  ;;  %2016 = vmatpush3.msra.mxu0 %v2719_v14 }
 0x1c6   : > { %2017 = vmatprep.mubr.msk.f32.mxu0 %vm2272_vm0, %v2271_v33  ;;  %2097 = vmatpush3.msra.mxu1 %v2533_v34 }
 0x1c7   : > { %2018 = vmatmul.mubr.f32.vlgmr.msra.gmra.mxu0 %v2743_v61  ;;  %2055 = vmatprep.subr.mxu0 %v2271_v33 }
 0x1c8   : > { %2098 = vmatprep.subr.mxu1 %v2271_v33  ;;  %2056 = vmatpush3.msra.mxu0 %v976_v26  ;;  %v3001_v26 = vand.u32 4294901760, %v2693_v59 }
 0x1c9   : > { %2099 = vmatpush3.msra.mxu1 %v2548_v40  ;;  %2057 = vmatprep.subr.mxu0 %v2271_v33 }
 0x1ca   : > { %2100 = vmatprep.subr.mxu1 %v2271_v33  ;;  %2058 = vmatpush3.msra.mxu0 %v983_v31 }
 0x1cb   : > { %2101 = vmatpush3.msra.mxu1 %v2558_v46  ;;  %2059 = vmatprep.subr.mxu0 %v2271_v33 }
 0x1cc   : > { %2102 = vmatprep.subr.mxu1 %v2271_v33  ;;  %2060 = vmatpush3.msra.mxu0 %v990_v38 }
 0x1cd   : > { %2103 = vmatpush3.msra.mxu1 %v2574_v52  ;;  %2061 = vmatprep.subr.mxu0 %v2271_v33 }
 0x1ce   : > { %2104 = vmatprep.subr.mxu1 %v2271_v33  ;;  %2062 = vmatpush3.msra.mxu0 %v997_v44 }
 0x1cf   : > { %2105 = vmatpush3.msra.mxu1 %v2587_v58  ;;  %2063 = vmatprep.subr.mxu0 %v2271_v33 }
 0x1d0   : > { %2106 = vmatprep.subr.mxu1 %v2271_v33  ;;  %2064 = vmatpush3.msra.mxu0 %v1004_v53 }
 0x1d1   : > { %2107 = vmatpush3.msra.mxu1 %v2605_v0  ;;  %2065 = vmatprep.subr.mxu0 %v2271_v33 }
 0x1d2   : > { %2108 = vmatprep.subr.mxu1 %v2271_v33  ;;  %2066 = vmatpush3.msra.mxu0 %v1011_v56 }
 0x1d3   : > { %2109 = vmatpush3.msra.mxu1 %v2621_v7  ;;  %2067 = vmatprep.subr.mxu0 %v2271_v33 }
 0x1d4   : > { %2110 = vmatprep.subr.mxu1 %v2271_v33  ;;  %2068 = vmatpush3.msra.mxu0 %v1018_v62 }
 0x1d5   : > { %2111 = vmatpush3.msra.mxu1 %v2632_v12  ;;  %2069 = vmatprep.subr.mxu0 %v2271_v33 }
 0x1d6   : > { %2112 = vmatprep.subr.mxu1 %v2271_v33  ;;  %2070 = vmatpush3.msra.mxu0 %v1025_v5 }
 0x1d7   : > { %2113 = vmatpush3.msra.mxu1 %v2649_v21  ;;  %2071 = vmatprep.subr.mxu0 %v2271_v33 }
 0x1d8   : > { %2114 = vmatprep.subr.mxu1 %v2271_v33  ;;  %2072 = vmatpush3.msra.mxu0 %v1032_v11 }
 0x1d9   : > { %2115 = vmatpush3.msra.mxu1 %v2662_v30  ;;  %2073 = vmatprep.subr.mxu0 %v2271_v33 }
 0x1da   : > { %2116 = vmatprep.subr.mxu1 %v2271_v33  ;;  %2074 = vmatpush3.msra.mxu0 %v1039_v25 }
 0x1db   : > { %2117 = vmatpush3.msra.mxu1 %v2680_v43  ;;  %2075 = vmatprep.subr.mxu0 %v2271_v33 }
 0x1dc   : > { %2118 = vmatprep.subr.mxu1 %v2271_v33  ;;  %2076 = vmatpush3.msra.mxu0 %v2998_v19 }
 0x1dd   : > { %2119 = vmatpush3.msra.mxu1 %v2696_v60  ;;  %2077 = vmatprep.subr.mxu0 %v2271_v33 }
 0x1de   : > { %2120 = vmatprep.subr.mxu1 %v2271_v33  ;;  %2078 = vmatpush3.msra.mxu0 %v2999_v22 }
 0x1df   : > { %2121 = vmatpush3.msra.mxu1 %v2707_v4  ;;  %2122 = vmatprep.mubr.msk.f32.mxu1 %vm2272_vm0, %v2271_v33 }
 0x1e0   : > { %2079 = vmatprep.subr.mxu0 %v2271_v33  ;;  %2123 = vmatmul.mubr.f32.vlgmr.msra.gmra.mxu1 %v2740_v24 }
 0x1e1   : > { %2080 = vmatpush3.msra.mxu0 %v3000_v23  ;;  %2087 = vmatprep.mubr.msk.f32.mxu0 %vm2272_vm0, %v2271_v33 }
 0x1e2   : > { %2081 = vmatprep.subr.mxu0 %v2271_v33 }
 0x1e3   : > { %2082 = vmatpush3.msra.mxu0 %v3001_v26 }
 0x1e4   : > { %2083 = vmatprep.subr.mxu0 %v2271_v33 }
 0x1e5   : > { %2084 = vmatpush3.msra.mxu0 %v3002_v27 }
 0x1e6   : > { %2085 = vmatprep.subr.mxu0 %v2271_v33 }
 0x1e7   : > { %2086 = vmatpush3.msra.mxu0 %v3003_v28 }
 0x1e8   : > { %2088 = vmatmul.mubr.f32.vlgmr.msra.gmra.mxu0 %v2740_v24 }
 0x25e   : > { %v1120_v31 = vpop.f32.mrf.mxu1 }
 0x260   : > { %v1984_v32 = vpop.f32.mrf.mxu1 }
 0x266   : > { %v969_v34 = vpop.f32.mrf.mxu0 }
 0x267   : > { %v970_v51 = vadd.f32 %v1707_v47, %v969_v34 }
 0x268   : > { %v1949_v38 = vpop.f32.mrf.mxu0 }
 0x269   : > { %v1121_v52 = vadd.f32 %v1120_v31, %v970_v51 }
 0x27e   : > { %v1313_v39 = vpop.f32.mrf.mxu1 }
 0x280   : > { %v2054_v40 = vpop.f32.mrf.mxu1 }
 0x287   : > { %v1224_v44 = vpop.f32.mrf.mxu0 }
 0x288   : > { %v1225_v56 = vadd.f32 %v1224_v44, %v1121_v52 }
 0x289   : > { %v2019_v46 = vpop.f32.mrf.mxu0 }
 0x28a   : > { %v1314_v57 = vadd.f32 %v1313_v39, %v1225_v56 }
 0x2a0   : > { %v1519_v33 = vpop.f32.mrf.mxu1 }
 0x2a2   : > { %v2124_v53 = vpop.f32.mrf.mxu1 }
 0x2a8   : > { %v1432_v58 = vpop.f32.mrf.mxu0 }
 0x2a9   : > { %v1433_v62 = vadd.f32 %v1432_v58, %v1314_v57 }
 0x2aa   : > { %v2089_v63 = vpop.f32.mrf.mxu0 }
 0x2ab   : > { %v1520_v0 = vadd.f32 %v1519_v33, %v1433_v62 }
 0x2ad   : > { %v1524_v5 = vrot.slane %v1520_v0, 1 }
 0x2af   : > { %v1526_v6 = vadd.f32 %v1524_v5, %v1520_v0 }
 0x2b1   : > { %v1708_v7 = vmul.f32 -1.442695, %v1526_v6  ;;  %1528 = vst.msk [vmem:[%s254_s17] sm:$0x1] %vm1527_vm6, %v1526_v6 }
 0x2b3   : > { %2173 = vpow2.f32 %v1708_v7 }
 0x2c0   : > { %v2174_v11 = vpop.eup %2173 }
 0x2c1   : > { %v1532_v12 = vadd.f32 1.0, %v2174_v11 }
 0x2c3   : > { %2175 = vrcp.f32 %v1532_v12 }
 0x2d0   : > { %v2176_v18 = vpop.eup %2175 }
 0x2d1   : > { %v1538_v21 = vrot.slane %v2176_v18, %v1537_v13 }
 0x2d3   : > { %1544 = vbcast.lane.b32.xlu1 %v1538_v21, 264  ;;  %1540 = vbcast.lane.b32.xlu0 %v1538_v21, 256 }
 0x2d4   : > { %2192 = shalt.err (!%p2189_p3)
}
 0x2d5   : > { %s2193_s14 = scalar_lea.hbm %s1610_s26, 16  ;;  %s2197_s18 = scalar_lea.hbm %s2989_s6, 32 }
 0x2d6   : > { %p2194_p4 = scmp.ne.s32.totalorder %s1610_s26, %s2193_s14  ;;  %p2198_p9 = scmp.lt.s32.totalorder %s1610_s26, %s2989_s6 }
 0x2d7   : > { %p2199_p10 = scmp.lt.s32.totalorder %s2197_s18, %s2193_s14 }
 0x2d8   : > { %p2195_p7 = pnand %p2194_p4, %p2350_p5 }
 0x2d9   : > { %p2200_p11 = por %p2199_p10, %p2198_p9 }
 0x2da   : > { %p2196_p8 = pneg %p2195_p7 }
 0x2dc   : > { %p2201_p12 = pnand %p2200_p11, %p2196_p8 }
 0x2de   : > { %2204 = shalt.err (!%p2201_p12)
}
 0x2df   : > { %2126 = dma.vmem_to_hbm [thread:$0]  (%p2350_p5), %s1613_s28, 16, %s1610_s26, %s1584_s29   ;;  %1548 = vbcast.lane.b32.xlu1 %v1538_v21, 272  ;;  %v1554_v45 = vld [vmem:[%s2365_s13] sm:$0xff]  ;;  %v1555_v25 = vld [vmem:[%s2365_s13 + $0x8] sm:$0xff]  ;;  %v2177_v30 = vld [vmem:[%s2365_s13 + $0x10] sm:$0xff] }
 0x2e0   : > { %s1703_s9 = sshll.u32 %s2905_s16, 6  ;;  %v2178_v43 = vld [vmem:[%s2365_s13 + $0x18] sm:$0xff]  ;;  %v1558_v4 = vld [vmem:[%s2365_s13 + $0x20] sm:$0xff]  ;;  %v1559_v8 = vld [vmem:[%s2365_s13 + $0x28] sm:$0xff]  ;;  %s1716_s26 = sshll.u32 %s2333_s25, 10 }
 0x2e1   : > { %s248_s10 = scalar_lea.vmem [#allocation2], %s1703_s9  ;;  %v1560_v50 = vld [vmem:[%s2365_s13 + $0x30] sm:$0xff]  ;;  %v1561_v54 = vld [vmem:[%s2365_s13 + $0x38] sm:$0xff]  ;;  %s2939_s12 = scalar_lea.hbm %s2988_s5, %s1716_s26 }
 0x2e2   : > { %s1596_s28 = sshll.u32 %s248_s10, 4  ;;  %s1579_s25 = scalar_lea.sflag [#allocation3], %s2905_s16  ;;  %s2941_s28 = int_to_ptr.vmem [resolvable:$true] %s1596_s28 }
 0x2e3   : > { %1552 = vbcast.lane.b32.xlu1 %v1538_v21, 280  ;;  %s2205_s14 = scalar_lea.vmem %s2941_s28, 1024  ;;  %s2274_s13 = smov [#allocation2]  }
 0x2e4   : > { %p2206_p13 = scmp.ne.s32.totalorder %s2941_s28, %s2205_s14  ;;  %s2209_s15 = sshll.u32 %s2274_s13, 4  ;;  %s2210_s15 = int_to_ptr.vmem [resolvable:$false] %s2209_s15 }
 0x2e5   : > { %s2211_s17 = scalar_lea.vmem %s2210_s15, 2048  ;;  %p2212_p2 = scmp.lt.s32.totalorder %s2941_s28, %s2210_s15 }
 0x2e6   : > { %p2207_p0 = pnand %p2206_p13, %p2350_p5  ;;  %p2213_p3 = scmp.lt.s32.totalorder %s2211_s17, %s2205_s14 }
 0x2e8   : > { %p2208_p1 = pneg %p2207_p0  ;;  %p2214_p4 = por %p2213_p3, %p2212_p2 }
 0x2ea   : > { %p2215_p7 = pnand %p2214_p4, %p2208_p1 }
 0x345   : > { %v1545_v24 = vpop.permute.xlu1 %1544  ;;  %v1541_v29 = vpop.permute.xlu0 %1540 }
 0x346   : > { %v1564_v42 = vmul.f32 %v2177_v30, %v1545_v24  ;;  %v1565_v59 = vmul.f32 %v2178_v43, %v1545_v24  ;;  %v1562_v60 = vmul.f32 %v1554_v45, %v1541_v29  ;;  %v1563_v3 = vmul.f32 %v1555_v25, %v1541_v29 }
 0x348   : > { %1572 = vst [vmem:[%s248_s10 + $0x10] sm:$0xff] %v1564_v42  ;;  %1573 = vst [vmem:[%s248_s10 + $0x18] sm:$0xff] %v1565_v59 }
 0x349   : > { %1570 = vst [vmem:[%s248_s10] sm:$0xff] %v1562_v60  ;;  %1571 = vst [vmem:[%s248_s10 + $0x8] sm:$0xff] %v1563_v3 }
 0x351   : > { %v1549_v14 = vpop.permute.xlu1 %1548 }
 0x352   : > { %v1566_v15 = vmul.f32 %v1558_v4, %v1549_v14  ;;  %v1567_v17 = vmul.f32 %v1559_v8, %v1549_v14 }
 0x354   : > { %1574 = vst [vmem:[%s248_s10 + $0x20] sm:$0xff] %v1566_v15  ;;  %1575 = vst [vmem:[%s248_s10 + $0x28] sm:$0xff] %v1567_v17 }
 0x355   : > { %v1553_v1 = vpop.permute.xlu1 %1552 }
 0x356   : > { %v1568_v2 = vmul.f32 %v1560_v50, %v1553_v1  ;;  %v1569_v9 = vmul.f32 %v1561_v54, %v1553_v1 }
 0x358   : > { %1576 = vst [vmem:[%s248_s10 + $0x30] sm:$0xff] %v1568_v2  ;;  %1577 = vst [vmem:[%s248_s10 + $0x38] sm:$0xff] %v1569_v9 }
 0x359   : > { %2218 = shalt.err (!%p2215_p7)
}
 0x35a   : > { %s2219_s18 = scalar_lea.hbm %s2939_s12, 1024  ;;  %s2223_s9 = scalar_lea.hbm %s2988_s5, 2048 }
 0x35b   : > { %p2220_p8 = scmp.ne.s32.totalorder %s2939_s12, %s2219_s18  ;;  %p2224_p11 = scmp.lt.s32.totalorder %s2939_s12, %s2988_s5 }
 0x35c   : > { %p2225_p12 = scmp.lt.s32.totalorder %s2223_s9, %s2219_s18 }
 0x35d   : > { %p2221_p9 = pnand %p2220_p8, %p2350_p5 }
 0x35e   : > { %p2226_p13 = por %p2225_p12, %p2224_p11 }
 0x35f   : > { %p2222_p10 = pneg %p2221_p9 }
 0x361   : > { %p2227_p0 = pnand %p2226_p13, %p2222_p10 }
 0x363   : > { %2230 = shalt.err (!%p2227_p0)
}
 0x364   : > { %s2275_s29 = smov 256   ;;  %s2276_s11 = smov 16  }
 0x365   : > { %2125 = dma.vmem_to_hbm [thread:$0]  (%p2350_p5), %s2941_s28, 1024, %s2939_s12, %s1579_s25, %s2275_s29, %s2275_s29, %s2276_s11  }
 0x366 PF: > { %p2136_p1 = scmp.ge.s32.totalorder %s2269_s24, 2  ;;  %s1624_s14 = sand.u32 1, %s2257_s21  }
 0x367   : > { %s1625_s13 = scalar_lea.sflag [#allocation3], %s1624_s14 }
 0x368   : > { %p2130_p2 = pnand %p2136_p1, %p2354_p6 }
 0x36a   : > { %p2131_p3 = pneg %p2130_p2 }
 0x36c   : > { %2248 = dma.done.wait (%p2131_p3), %s1625_s13, 1024  }
 0x36d   : > { %2250 = vsyncadd (%p2131_p3), %s1625_s13, 4294966272  ;;  %s1634_s15 = scalar_lea.sflag [#allocation5], %s1624_s14 }
 0x36e   : > { %2252 = dma.done.wait (%p2131_p3), %s1634_s15, 16  }
 0x36f   : > { %2254 = vsyncadd (%p2131_p3), %s1634_s15, 4294967280  ;;  %p20_p5 = scmp.ge.s32.totalorder %s2337_s27, 4   ;;  %s3004_s21 = smov %s2261_s22 }
 0x370   : > { %s3005_s22 = smov %s2265_s23  ;;  %s3006_s23 = smov %s2348_s30 }
 0x371   : > { %s3007_s24 = smov %s2337_s27  ;;  %22 = sbr.rel (!%p20_p5) target bundleno = 5 (0x5), region = 92 }
 0x376   :  { %1638 = vsyncpa [#allocation3], 1 }
 0x377   :  { %1640 = vsyncpa [#allocation3 + $0x1], 1 }
 0x378   :  { %1641 = vsyncpa [#allocation5], 1 }
 0x379   :  { %1643 = vsyncpa [#allocation5 + $0x1], 1 }

</bundles_post_ra>
